<compile_context>
chip_gen: v7x
topology: tpu7x:2x2x1
jax: 0.10.0
libtpu: 0.0.40
codegen_flags: <defaults>
</compile_context>

<pallas_src>
import functools
import math

import jax
import jax.numpy as jnp
import numpy as np
from jax import lax
from jax.experimental import pallas as pl
from jax.experimental.pallas import tpu as pltpu

_MIB = 1024 * 1024

# Weights/biases have constant index_maps, so one VMEM buffer suffices (the
# block is never re-fetched); Buffered(1) disables the default double buffer.
_SINGLE_BUFFER = (
    {"pipeline_mode": pl.Buffered(1)} if hasattr(pl, "Buffered") else {}
)


def _vmem_limit(bytes_needed):
    """Scoped-VMEM request sized to the kernel, capped per chip generation."""
    try:
        cap = pltpu.get_tpu_info().vmem_capacity_bytes
    except Exception:  # conservative (v7x-safe) fallback
        cap = 64 * _MIB
    return int(min(max(int(1.5 * bytes_needed), 32 * _MIB), int(0.8 * cap)))


def _choose_tile(s, preferred=(256, 128)):
    """Largest preferred tile dividing s (256 matches the 256-wide MXU on
    v6e/v7x; 128 is fine for v5e's 128-wide MXU); else the full extent."""
    for t in preferred:
        if s >= t and s % t == 0:
            return t
    return s


# ---------------------------------------------------------------------------
# Kernel 1: fused Q/K/V projection (computed exactly once per token).
# ---------------------------------------------------------------------------
def _qkv_proj_kernel(x_ref, wq_ref, bq_ref, wk_ref, bk_ref, wv_ref, bv_ref,
                     q_ref, k_ref, v_ref):
    # Lane-dense (ts, D) x (D, D) matmuls; bf16 operands, f32 accumulation.
    # The 1/sqrt(d_head) softmax scale is folded into wq/bq on the host.
    x = x_ref[0].astype(jnp.bfloat16)
    q = jnp.dot(x, wq_ref[...], preferred_element_type=jnp.float32) + bq_ref[...]
    k = jnp.dot(x, wk_ref[...], preferred_element_type=jnp.float32) + bk_ref[...]
    v = jnp.dot(x, wv_ref[...], preferred_element_type=jnp.float32) + bv_ref[...]
    q_ref[0] = q.astype(q_ref.dtype)
    k_ref[0] = k.astype(k_ref.dtype)
    v_ref[0] = v.astype(v_ref.dtype)


# ---------------------------------------------------------------------------
# Kernel 2: flash attention (online softmax) + fused output projection.
# ---------------------------------------------------------------------------
def _flash_attn_kernel(q_ref, k_ref, v_ref, wo_ref, bo_ref, o_ref,
                       acc_sc, m_sc, l_sc, *, num_head, d_head, tq, tk):
    qi = pl.program_id(1)
    ki = pl.program_id(2)
    nk = pl.num_programs(2)
    q_start = qi * tq
    kv_start = ki * tk

    @pl.when(ki == 0)
    def _init():
        m_sc[...] = jnp.full(m_sc.shape, -jnp.inf, dtype=m_sc.dtype)
        l_sc[...] = jnp.zeros(l_sc.shape, dtype=l_sc.dtype)
        acc_sc[...] = jnp.zeros(acc_sc.shape, dtype=acc_sc.dtype)

    # Skip KV tiles entirely above the causal diagonal for this query tile.
    # (Their HBM fetch is already elided by the clamped kv index_map.)
    @pl.when(kv_start <= q_start + (tq - 1))
    def _compute():
        q = q_ref[0]                      # (tq, D) bf16, pre-scaled by 1/sqrt(dh)
        k = k_ref[0]                      # (tk, D) bf16
        v = v_ref[0]                      # (tk, D) bf16

        row = q_start + lax.broadcasted_iota(jnp.int32, (tq, tk), 0)
        col = kv_start + lax.broadcasted_iota(jnp.int32, (tq, tk), 1)
        causal = col > row

        # Static unroll over heads (typically <= 8-16); scratch is flat and
        # lane-dense, per-head regions are static lane slices.
        # TODO(synk): for very large num_head switch to lax.fori_loop with
        # dynamic lane slices to bound vreg live ranges.
        for h in range(num_head):
            lo = h * d_head
            hi = lo + d_head
            s = lax.dot_general(q[:, lo:hi], k[:, lo:hi],
                                (((1,), (1,)), ((), ())),
                                preferred_element_type=jnp.float32)
            s = jnp.where(causal, -jnp.inf, s)

            m_prev = m_sc[:, h:h + 1]                               # (tq, 1)
            m_new = jnp.maximum(m_prev, jnp.max(s, axis=-1, keepdims=True))
            alpha = jnp.exp(m_prev - m_new)
            p = jnp.exp(s - m_new)
            l_sc[:, h:h + 1] = alpha * l_sc[:, h:h + 1] + jnp.sum(
                p, axis=-1, keepdims=True)
            acc_sc[:, lo:hi] = alpha * acc_sc[:, lo:hi] + jnp.dot(
                p.astype(jnp.bfloat16), v[:, lo:hi],
                preferred_element_type=jnp.float32)
            m_sc[:, h:h + 1] = m_new

    @pl.when(ki == nk - 1)
    def _finish():
        # Normalize each head in place (exact reciprocal: once per query tile,
        # essentially free), then one fused lane-dense (tq, D) x (D, D) output
        # projection on the MXU.  No concatenate needed: acc is already flat.
        for h in range(num_head):
            lo = h * d_head
            hi = lo + d_head
            inv_l = pl.reciprocal(l_sc[:, h:h + 1], approx=False)
            acc_sc[:, lo:hi] = acc_sc[:, lo:hi] * inv_l
        attn = acc_sc[...].astype(jnp.bfloat16)                     # (tq, D)
        out = jnp.dot(attn, wo_ref[...],
                      preferred_element_type=jnp.float32) + bo_ref[...]
        o_ref[0] = out.astype(o_ref.dtype)


# ---------------------------------------------------------------------------
# Wrapper
# ---------------------------------------------------------------------------
def attention_forward(x, params, *, num_head, tq=None, tk=None, ts=None):
    """Causal multi-head self-attention (PyTorch module with masked=None)."""
    B, S, D = x.shape
    assert D % num_head == 0
    d_head = D // num_head
    wq, bq, wk, bk, wv, bv, wo, bo = params

    tq = _choose_tile(S) if tq is None else tq
    tk = _choose_tile(S) if tk is None else tk
    ts = _choose_tile(S) if ts is None else ts
    assert S % tq == 0 and S % tk == 0 and S % ts == 0

    # Host-side weight prep (free): transpose so out-features land on lanes,
    # fold the softmax scale into Q, cast weights to bf16 (biases stay f32).
    scale = 1.0 / math.sqrt(d_head)
    wq_t = (wq.T * scale).astype(jnp.bfloat16)
    wk_t = wk.T.astype(jnp.bfloat16)
    wv_t = wv.T.astype(jnp.bfloat16)
    wo_t = wo.T.astype(jnp.bfloat16)
    bq_s = (bq * scale).astype(jnp.float32)
    bk_f = bk.astype(jnp.float32)
    bv_f = bv.astype(jnp.float32)
    bo_f = bo.astype(jnp.float32)

    # ---- pass 1: Q/K/V projection (once per token) -----------------------
    const2 = lambda b, si: (0, 0)
    seq_map = lambda b, si: (b, si, 0)
    proj_bytes = (2 * ts * D * 4                       # x tile (f32, dbl-buf)
                  + 3 * 2 * ts * D * 2                 # q/k/v tiles (bf16)
                  + 3 * (D * D * 2 + D * 4))           # weights + biases
    q, k, v = pl.pallas_call(
        _qkv_proj_kernel,
        out_shape=(jax.ShapeDtypeStruct((B, S, D), jnp.bfloat16),
                   jax.ShapeDtypeStruct((B, S, D), jnp.bfloat16),
                   jax.ShapeDtypeStruct((B, S, D), jnp.bfloat16)),
        grid_spec=pltpu.PrefetchScalarGridSpec(
            num_scalar_prefetch=0,
            grid=(B, S // ts),
            in_specs=[
                pl.BlockSpec((1, ts, D), seq_map),
                pl.BlockSpec((D, D), const2, **_SINGLE_BUFFER),
                pl.BlockSpec((1, D), const2, **_SINGLE_BUFFER),
                pl.BlockSpec((D, D), const2, **_SINGLE_BUFFER),
                pl.BlockSpec((1, D), const2, **_SINGLE_BUFFER),
                pl.BlockSpec((D, D), const2, **_SINGLE_BUFFER),
                pl.BlockSpec((1, D), const2, **_SINGLE_BUFFER),
            ],
            out_specs=[
                pl.BlockSpec((1, ts, D), seq_map),
                pl.BlockSpec((1, ts, D), seq_map),
                pl.BlockSpec((1, ts, D), seq_map),
            ],
        ),
        compiler_params=pltpu.CompilerParams(
            dimension_semantics=("parallel", "parallel"),
            vmem_limit_bytes=_vmem_limit(proj_bytes),
        ),
    )(x, wq_t, bq_s, wk_t, bk_f, wv_t, bv_f)

    # ---- pass 2: flash attention + fused W_o ------------------------------
    def kv_map(b, qi, ki):
        # Clamp to the last KV block a causal query tile can see: repeated
        # block indices elide the DMA for fully-masked tiles.
        last = (qi * tq + tq - 1) // tk
        return (b, jnp.minimum(ki, last), 0)

    const3 = lambda b, qi, ki: (0, 0)
    kernel = functools.partial(_flash_attn_kernel, num_head=num_head,
                               d_head=d_head, tq=tq, tk=tk)

    flash_bytes = (2 * tq * D * 2                      # q tile (bf16, dbl-buf)
                   + 2 * 2 * tk * D * 2                # k, v tiles
                   + 2 * tq * D * 4                    # out tile (f32)
                   + (D * D * 2 + D * 4)               # wo + bo (single buf)
                   + tq * D * 4                        # acc scratch
                   + 2 * tq * 128 * 4                  # m, l (lane padded)
                   + 2 * tq * tk * 4)                  # s / p temporaries

    return pl.pallas_call(
        kernel,
        out_shape=jax.ShapeDtypeStruct((B, S, D), x.dtype),
        grid_spec=pltpu.PrefetchScalarGridSpec(
            num_scalar_prefetch=0,
            grid=(B, S // tq, S // tk),
            in_specs=[
                pl.BlockSpec((1, tq, D), lambda b, qi, ki: (b, qi, 0)),
                pl.BlockSpec((1, tk, D), kv_map),
                pl.BlockSpec((1, tk, D), kv_map),
                pl.BlockSpec((D, D), const3, **_SINGLE_BUFFER),
                pl.BlockSpec((1, D), const3, **_SINGLE_BUFFER),
            ],
            out_specs=pl.BlockSpec((1, tq, D), lambda b, qi, ki: (b, qi, 0)),
            scratch_shapes=[
                pltpu.VMEM((tq, D), jnp.float32),         # flat attn accumulator
                pltpu.VMEM((tq, num_head), jnp.float32),  # running max m
                pltpu.VMEM((tq, num_head), jnp.float32),  # running sum l
            ],
        ),
        compiler_params=pltpu.CompilerParams(
            # Only batch is sharded across TensorCores: causal query tiles
            # have uneven KV trip counts, so batch sharding keeps the two
            # v7x cores balanced.
            dimension_semantics=("parallel", "arbitrary", "arbitrary"),
            vmem_limit_bytes=_vmem_limit(flash_bytes),
        ),
    )(q, k, v, wo_t, bo_f)


# ---------------------------------------------------------------------------
# Pure-JAX reference + test harness
# ---------------------------------------------------------------------------
def attention_reference(x, params, *, num_head):
    B, S, D = x.shape
    d_head = D // num_head
    wq, bq, wk, bk, wv, bv, wo, bo = params

    def lin(t, w, b):
        return t @ w.T + b[0]

    q = lin(x, wq, bq).reshape(B, S, num_head, d_head).transpose(0, 2, 1, 3)
    k = lin(x, wk, bk).reshape(B, S, num_head, d_head).transpose(0, 2, 1, 3)
    v = lin(x, wv, bv).reshape(B, S, num_head, d_head).transpose(0, 2, 1, 3)

    scores = jnp.einsum("bhqd,bhkd->bhqk", q, k)
    mask = jnp.triu(jnp.ones((S, S), dtype=bool), k=1)
    scores = jnp.where(mask[None, None], -jnp.inf, scores) / math.sqrt(d_head)
    p = jax.nn.softmax(scores, axis=-1)
    attn = jnp.einsum("bhqk,bhkd->bhqd", p, v)
    attn = attn.transpose(0, 2, 1, 3).reshape(B, S, D)
    return lin(attn, wo, bo)


def init_params(key, d_model):
    """nn.Linear-style U(-1/sqrt(in), 1/sqrt(in)) init."""
    keys = jax.random.split(key, 8)
    bound = 1.0 / math.sqrt(d_model)
    params = []
    for i in range(4):
        w = jax.random.uniform(keys[2 * i], (d_model, d_model),
                               jnp.float32, -bound, bound)
        b = jax.random.uniform(keys[2 * i + 1], (1, d_model),
                               jnp.float32, -bound, bound)
        params += [w, b]
    return tuple(params)


if __name__ == "__main__":
    configs = [
        # (B, S, d_model, num_head, tq, tk, ts)
        (2, 8, 32, 4, None, None, None),     # tiny single-tile path
        (2, 256, 32, 4, 128, 128, 128),      # multi-tile flash / causal-skip path
    ]
    root = jax.random.PRNGKey(0)
    for i, (B, S, d_model, num_head, tq, tk, ts) in enumerate(configs):
        kx, kp = jax.random.split(jax.random.fold_in(root, i))
        x = jax.random.normal(kx, (B, S, d_model), dtype=jnp.float32)
        params = init_params(kp, d_model)

        out = attention_forward(x, params, num_head=num_head, tq=tq, tk=tk, ts=ts)
        out = jax.block_until_ready(out)

        ref = attention_reference(x, params, num_head=num_head)
        # Tolerance accounts for bf16 MXU operands (f32 accumulation).
        np.testing.assert_allclose(np.asarray(out), np.asarray(ref),
                                   rtol=2e-2, atol=2e-2)

    print("KERNEL_OK")
</pallas_src>

<mosaic_0001>
module attributes {stable_mosaic.version = 11 : i64} {
  func.func @_qkv_proj_kernel(%arg0: i32, %arg1: i32, %arg2: memref<1x8x32xf32, #tpu.memory_space<vmem>>, %arg3: memref<32x32xbf16, #tpu.memory_space<vmem>>, %arg4: memref<1x32xf32, #tpu.memory_space<vmem>>, %arg5: memref<32x32xbf16, #tpu.memory_space<vmem>>, %arg6: memref<1x32xf32, #tpu.memory_space<vmem>>, %arg7: memref<32x32xbf16, #tpu.memory_space<vmem>>, %arg8: memref<1x32xf32, #tpu.memory_space<vmem>>, %arg9: memref<1x8x32xbf16, #tpu.memory_space<vmem>>, %arg10: memref<1x8x32xbf16, #tpu.memory_space<vmem>>, %arg11: memref<1x8x32xbf16, #tpu.memory_space<vmem>>) attributes {dimension_semantics = [#tpu.dimension_semantics<parallel>, #tpu.dimension_semantics<parallel>], iteration_bounds = array<i64: 2, 1>, scalar_prefetch = 0 : i64, scratch_operands = 0 : i64, tpu.core_type = #tpu.core_type<tc>, window_params = [{transform_indices = @transform_0, window_bounds = array<i64: 1, 8, 32>}, {pipeline_mode = #tpu.pipeline_mode<synchronous>, transform_indices = @transform_1, window_bounds = array<i64: 32, 32>}, {pipeline_mode = #tpu.pipeline_mode<synchronous>, transform_indices = @transform_2, window_bounds = array<i64: 1, 32>}, {pipeline_mode = #tpu.pipeline_mode<synchronous>, transform_indices = @transform_3, window_bounds = array<i64: 32, 32>}, {pipeline_mode = #tpu.pipeline_mode<synchronous>, transform_indices = @transform_4, window_bounds = array<i64: 1, 32>}, {pipeline_mode = #tpu.pipeline_mode<synchronous>, transform_indices = @transform_5, window_bounds = array<i64: 32, 32>}, {pipeline_mode = #tpu.pipeline_mode<synchronous>, transform_indices = @transform_6, window_bounds = array<i64: 1, 32>}, {transform_indices = @transform_7, window_bounds = array<i64: 1, 8, 32>}, {transform_indices = @transform_8, window_bounds = array<i64: 1, 8, 32>}, {transform_indices = @transform_9, window_bounds = array<i64: 1, 8, 32>}]} {
    %c0 = arith.constant 0 : index
    %c0_0 = arith.constant 0 : index
    %c0_1 = arith.constant 0 : index
    %0 = vector.load %arg2[%c0, %c0_0, %c0_1] : memref<1x8x32xf32, #tpu.memory_space<vmem>>, vector<1x8x32xf32>
    %1 = vector.shape_cast %0 : vector<1x8x32xf32> to vector<8x32xf32>
    %2 = arith.truncf %1 : vector<8x32xf32> to vector<8x32xbf16>
    %c0_2 = arith.constant 0 : index
    %c0_3 = arith.constant 0 : index
    %3 = vector.load %arg3[%c0_2, %c0_3] : memref<32x32xbf16, #tpu.memory_space<vmem>>, vector<32x32xbf16>
    %cst = arith.constant dense<0.000000e+00> : vector<8x32xf32>
    %4 = tpu.matmul %2, %3, %cst {dimension_numbers = #tpu.dot_dimension_numbers<[1], [0], [0], [1], [0, 0, 1, 1], [], []>} : vector<8x32xbf16>, vector<32x32xbf16>, vector<8x32xf32> -> vector<8x32xf32>
    %c0_4 = arith.constant 0 : index
    %c0_5 = arith.constant 0 : index
    %5 = vector.load %arg4[%c0_4, %c0_5] : memref<1x32xf32, #tpu.memory_space<vmem>>, vector<1x32xf32>
    %6 = vector.broadcast %5 : vector<1x32xf32> to vector<8x32xf32>
    %7 = arith.addf %4, %6 : vector<8x32xf32>
    %c0_6 = arith.constant 0 : index
    %c0_7 = arith.constant 0 : index
    %8 = vector.load %arg5[%c0_6, %c0_7] : memref<32x32xbf16, #tpu.memory_space<vmem>>, vector<32x32xbf16>
    %cst_8 = arith.constant dense<0.000000e+00> : vector<8x32xf32>
    %9 = tpu.matmul %2, %8, %cst_8 {dimension_numbers = #tpu.dot_dimension_numbers<[1], [0], [0], [1], [0, 0, 1, 1], [], []>} : vector<8x32xbf16>, vector<32x32xbf16>, vector<8x32xf32> -> vector<8x32xf32>
    %c0_9 = arith.constant 0 : index
    %c0_10 = arith.constant 0 : index
    %10 = vector.load %arg6[%c0_9, %c0_10] : memref<1x32xf32, #tpu.memory_space<vmem>>, vector<1x32xf32>
    %11 = vector.broadcast %10 : vector<1x32xf32> to vector<8x32xf32>
    %12 = arith.addf %9, %11 : vector<8x32xf32>
    %c0_11 = arith.constant 0 : index
    %c0_12 = arith.constant 0 : index
    %13 = vector.load %arg7[%c0_11, %c0_12] : memref<32x32xbf16, #tpu.memory_space<vmem>>, vector<32x32xbf16>
    %cst_13 = arith.constant dense<0.000000e+00> : vector<8x32xf32>
    %14 = tpu.matmul %2, %13, %cst_13 {dimension_numbers = #tpu.dot_dimension_numbers<[1], [0], [0], [1], [0, 0, 1, 1], [], []>} : vector<8x32xbf16>, vector<32x32xbf16>, vector<8x32xf32> -> vector<8x32xf32>
    %c0_14 = arith.constant 0 : index
    %c0_15 = arith.constant 0 : index
    %15 = vector.load %arg8[%c0_14, %c0_15] : memref<1x32xf32, #tpu.memory_space<vmem>>, vector<1x32xf32>
    %16 = vector.broadcast %15 : vector<1x32xf32> to vector<8x32xf32>
    %17 = arith.addf %14, %16 : vector<8x32xf32>
    %18 = arith.truncf %7 : vector<8x32xf32> to vector<8x32xbf16>
    %c0_16 = arith.constant 0 : index
    %c0_17 = arith.constant 0 : index
    %c0_18 = arith.constant 0 : index
    %19 = vector.load %arg9[%c0_16, %c0_17, %c0_18] : memref<1x8x32xbf16, #tpu.memory_space<vmem>>, vector<1x8x32xbf16>
    %20 = vector.shape_cast %19 : vector<1x8x32xbf16> to vector<8x32xbf16>
    %21 = vector.shape_cast %18 : vector<8x32xbf16> to vector<1x8x32xbf16>
    tpu.vector_store %arg9[%c0_16, %c0_17, %c0_18], %21 {strides = array<i32>} : memref<1x8x32xbf16, #tpu.memory_space<vmem>>, vector<1x8x32xbf16>,
    %22 = arith.truncf %12 : vector<8x32xf32> to vector<8x32xbf16>
    %c0_19 = arith.constant 0 : index
    %c0_20 = arith.constant 0 : index
    %c0_21 = arith.constant 0 : index
    %23 = vector.load %arg10[%c0_19, %c0_20, %c0_21] : memref<1x8x32xbf16, #tpu.memory_space<vmem>>, vector<1x8x32xbf16>
    %24 = vector.shape_cast %23 : vector<1x8x32xbf16> to vector<8x32xbf16>
    %25 = vector.shape_cast %22 : vector<8x32xbf16> to vector<1x8x32xbf16>
    tpu.vector_store %arg10[%c0_19, %c0_20, %c0_21], %25 {strides = array<i32>} : memref<1x8x32xbf16, #tpu.memory_space<vmem>>, vector<1x8x32xbf16>,
    %26 = arith.truncf %17 : vector<8x32xf32> to vector<8x32xbf16>
    %c0_22 = arith.constant 0 : index
    %c0_23 = arith.constant 0 : index
    %c0_24 = arith.constant 0 : index
    %27 = vector.load %arg11[%c0_22, %c0_23, %c0_24] : memref<1x8x32xbf16, #tpu.memory_space<vmem>>, vector<1x8x32xbf16>
    %28 = vector.shape_cast %27 : vector<1x8x32xbf16> to vector<8x32xbf16>
    %29 = vector.shape_cast %26 : vector<8x32xbf16> to vector<1x8x32xbf16>
    tpu.vector_store %arg11[%c0_22, %c0_23, %c0_24], %29 {strides = array<i32>} : memref<1x8x32xbf16, #tpu.memory_space<vmem>>, vector<1x8x32xbf16>,
    return
  }
  func.func @transform_0(%arg0: i32, %arg1: i32) -> (i32, i32, i32) {
    %c0_i32 = arith.constant 0 : i32
    %c0_i32_0 = arith.constant 0 : i32
    return %arg0, %arg1, %c0_i32 : i32, i32, i32
  }
  func.func @transform_1(%arg0: i32, %arg1: i32) -> (i32, i32) {
    %c0_i32 = arith.constant 0 : i32
    %c0_i32_0 = arith.constant 0 : i32
    %c0_i32_1 = arith.constant 0 : i32
    return %c0_i32, %c0_i32_0 : i32, i32
  }
  func.func @transform_2(%arg0: i32, %arg1: i32) -> (i32, i32) {
    %c0_i32 = arith.constant 0 : i32
    %c0_i32_0 = arith.constant 0 : i32
    %c0_i32_1 = arith.constant 0 : i32
    return %c0_i32, %c0_i32_0 : i32, i32
  }
  func.func @transform_3(%arg0: i32, %arg1: i32) -> (i32, i32) {
    %c0_i32 = arith.constant 0 : i32
    %c0_i32_0 = arith.constant 0 : i32
    %c0_i32_1 = arith.constant 0 : i32
    return %c0_i32, %c0_i32_0 : i32, i32
  }
  func.func @transform_4(%arg0: i32, %arg1: i32) -> (i32, i32) {
    %c0_i32 = arith.constant 0 : i32
    %c0_i32_0 = arith.constant 0 : i32
    %c0_i32_1 = arith.constant 0 : i32
    return %c0_i32, %c0_i32_0 : i32, i32
  }
  func.func @transform_5(%arg0: i32, %arg1: i32) -> (i32, i32) {
    %c0_i32 = arith.constant 0 : i32
    %c0_i32_0 = arith.constant 0 : i32
    %c0_i32_1 = arith.constant 0 : i32
    return %c0_i32, %c0_i32_0 : i32, i32
  }
  func.func @transform_6(%arg0: i32, %arg1: i32) -> (i32, i32) {
    %c0_i32 = arith.constant 0 : i32
    %c0_i32_0 = arith.constant 0 : i32
    %c0_i32_1 = arith.constant 0 : i32
    return %c0_i32, %c0_i32_0 : i32, i32
  }
  func.func @transform_7(%arg0: i32, %arg1: i32) -> (i32, i32, i32) {
    %c0_i32 = arith.constant 0 : i32
    %c0_i32_0 = arith.constant 0 : i32
    return %arg0, %arg1, %c0_i32 : i32, i32, i32
  }
  func.func @transform_8(%arg0: i32, %arg1: i32) -> (i32, i32, i32) {
    %c0_i32 = arith.constant 0 : i32
    %c0_i32_0 = arith.constant 0 : i32
    return %arg0, %arg1, %c0_i32 : i32, i32, i32
  }
  func.func @transform_9(%arg0: i32, %arg1: i32) -> (i32, i32, i32) {
    %c0_i32 = arith.constant 0 : i32
    %c0_i32_0 = arith.constant 0 : i32
    return %arg0, %arg1, %c0_i32 : i32, i32, i32
  }
}

</mosaic_0001>

<bundles_post_ra>
// kernel: tpu_custom_call.1
= control target key start
LH: loop header
LB: loop body
LE: loop exit
PB: predicated region body
PF: predicated region fallthrough
CT: control target
= control target key end

     0   :  { %s1649_s0 = inlined_call_operand.hbm [shape: f32[2,8,32], index: 0, kind: input, shape index: {}]   ;;  %s1650_s1 = inlined_call_operand.hbm [shape: bf16[32,32], index: 1, kind: input, shape index: {}]   ;;  %s1651_s2 = inlined_call_operand.vmem [shape: f32[1,32], index: 2, kind: input, shape index: {}]   ;;  %s1652_s3 = inlined_call_operand.hbm [shape: bf16[32,32], index: 3, kind: input, shape index: {}]   ;;  %s1653_s4 = inlined_call_operand.vmem [shape: f32[1,32], index: 4, kind: input, shape index: {}]   ;;  %s1654_s5 = inlined_call_operand.vmem [shape: bf16[32,32], index: 5, kind: input, shape index: {}]   ;;  %s1655_s6 = inlined_call_operand.vmem [shape: f32[1,32], index: 6, kind: input, shape index: {}]   ;;  %s1656_s7 = inlined_call_operand.hbm [shape: bf16[2,8,32], index: 7, kind: output, shape index: {0}]   ;;  %s1657_s8 = inlined_call_operand.hbm [shape: bf16[2,8,32], index: 8, kind: output, shape index: {1}]   ;;  %s1658_s9 = inlined_call_operand.hbm [shape: bf16[2,8,32], index: 9, kind: output, shape index: {2}]  }
   0x1   :  { %1667 = sst [smem:[#allocation18_spill]] %s1649_s0 }
   0x2   :  { %1668 = sst [smem:[#allocation19_spill]] %s1650_s1 }
   0x3   :  { %1669 = sst [smem:[#allocation20_spill]] %s1658_s9 }
   0x4   :  { %15 = vsyncpa [#allocation3], 0 }
   0x5   :  { %17 = vsyncpa [#allocation3 + $0x1], 0 }
   0x6   :  { %18 = vsyncpa [#allocation6], 0 }
   0x7   :  { %19 = vsyncpa [#allocation4], 0 }
   0x8   :  { %21 = vsyncpa [#allocation4 + $0x1], 0 }
   0x9   :  { %22 = vsyncpa [#allocation10], 0 }
   0xa   :  { %24 = vsyncpa [#allocation10 + $0x1], 0  ;;  %s1299_s30 = smov 0   ;;  %s1301_s10 = smov 0  }
   0xb   :  { %s1303_s11 = smov 0   ;;  %s1305_s12 = smov 0  }
   0xc   :  { %s1307_s13 = smov 0   ;;  %s1309_s14 = smov 0  }
   0xd LB: > { %1670 = sst [smem:[#allocation16_spill]] %s1217_s30  ;;  %s1330_s15 = sadd.s32 4294967295, %s1237_s14   ;;  %s1237_s14 = sphi %s1309_s14, %s30_s14   ;;  %s1233_s13 = sphi %s1307_s13, %s1698_s13   ;;  %s1229_s12 = sphi %s1305_s12, %s1697_s12   ;;  %s1225_s11 = sphi %s1303_s11, %s1696_s11   ;;  %s1221_s10 = sphi %s1301_s10, %s1695_s10   ;;  %s1217_s30 = sphi %s1299_s30, %s1694_s30  }
   0xe   : > { %s1659_s16 = sadd.s32 4294967294, %s1237_s14   ;;  %p64_p0 = scmp.ne.s32.totalorder %s1221_s10, %s1217_s30 }
   0xf   : > { %p1660_p1 = scmp.eq.s32.totalorder %s1330_s15, 0  ;;  %p222_p3 = scmp.eq.s32.totalorder %s1659_s16, 1 }
  0x10   : > { %p836_p5 = scmp.ge.s32.totalorder %s1237_s14, 1  ;;  %p285_p7 = scmp.lt.s32.totalorder %s1237_s14, 3 }
  0x11   : > { %p1341_p4 = por %p1660_p1, %p64_p0  ;;  %p1346_p6 = por %p222_p3, %p64_p0 }
  0x12   : > { %p1351_p8 = pnand %p836_p5, %p285_p7  ;;  %s1239_s20 = smov [#allocation5]  }
  0x13   : > { %s1671_s17 = scalar_select %p1341_p4, 1, 0 }
  0x14   : > { %s1672_s18 = scalar_select %p1346_p6, 1, 0 }
  0x15   : > { %s297_s21 = sshll.u32 %s1239_s20, 4  ;;  %p918_p9 = pneg %p1351_p8  ;;  %s1355_s21 = int_to_ptr.vmem [resolvable:$true] %s297_s21 }
  0x16   : > { %1673 = sst [smem:[#allocation17_spill]] %s1672_s18  ;;  %s1240_s23 = smov [#allocation7]  }
  0x17   : > { %p1362_p11 = pnand %p918_p9, %p1660_p1  ;;  %s313_s24 = sshll.u32 %s1240_s23, 4  ;;  %s1366_s24 = int_to_ptr.vmem [resolvable:$true] %s313_s24 }
  0x18   : > { %s1676_s1 = sld [smem:[#allocation19_spill]] }
  0x19   : > { %p1007_p13 = pneg %p1362_p11 }
  0x1e   : > { %s1005_s27 = scalar_lea.hbm %s1676_s1, 256 }
  0x1f   : > { %p1006_p12 = scmp.ne.s32.totalorder %s1676_s1, %s1005_s27  ;;  %p1012_p5 = scmp.lt.u32.totalorder %s1005_s27, %s1676_s1 }
  0x21   : > { %p1008_p0 = pnand %p1007_p13, %p1006_p12 }
  0x23   : > { %p1009_p3 = pneg %p1008_p0 }
  0x25   : > { %p1014_p7 = pnand %p1012_p5, %p1009_p3 }
  0x27   : > { %1017 = shalt.err (!%p1014_p7)
}
  0x28   : > { %s1018_s23 = scalar_lea.vmem %s1355_s21, 256  ;;  %p1026_p2 = scmp.lt.s32.totalorder %s1355_s21, %s1355_s21 }
  0x29   : > { %p1019_p9 = scmp.ne.s32.totalorder %s1355_s21, %s1018_s23  ;;  %p1027_p12 = scmp.lt.s32.totalorder %s1018_s23, %s1018_s23 }
  0x2b   : > { %p1021_p10 = pnand %p1019_p9, %p1007_p13  ;;  %p1028_p0 = por %p1027_p12, %p1026_p2 }
  0x2d   : > { %p1022_p1 = pneg %p1021_p10 }
  0x2f   : > { %p1029_p6 = pnand %p1028_p0, %p1022_p1 }
  0x31   : > { %1032 = shalt.err (!%p1029_p6)
}
  0x32   : > { %s1241_s16 = smov 64   ;;  %s1242_s25 = smov 4  }
  0x33   : > { %921 = dma.hbm_to_vmem [thread:$0]  (!%p1362_p11), %s1676_s1, 256, %s1355_s21, [#allocation6], %s1241_s16, %s1241_s16, %s1242_s25  }
  0x34   : > { %s1033_s20 = scalar_lea.hbm %s1652_s3, 256 }
  0x35   : > { %p1034_p2 = scmp.ne.s32.totalorder %s1652_s3, %s1033_s20  ;;  %p1040_p10 = scmp.lt.u32.totalorder %s1033_s20, %s1652_s3 }
  0x37   : > { %p1036_p1 = pnand %p1034_p2, %p1007_p13 }
  0x39   : > { %p1037_p6 = pneg %p1036_p1 }
  0x3b   : > { %p1042_p3 = pnand %p1040_p10, %p1037_p6 }
  0x3d   : > { %1045 = shalt.err (!%p1042_p3)
}
  0x3e   : > { %s1046_s21 = scalar_lea.vmem %s1366_s24, 256  ;;  %p1054_p12 = scmp.lt.s32.totalorder %s1366_s24, %s1366_s24 }
  0x3f   : > { %p1047_p5 = scmp.ne.s32.totalorder %s1366_s24, %s1046_s21  ;;  %p1055_p0 = scmp.lt.s32.totalorder %s1046_s21, %s1046_s21 }
  0x41   : > { %p1049_p7 = pnand %p1047_p5, %p1007_p13  ;;  %p1056_p2 = por %p1055_p0, %p1054_p12 }
  0x43   : > { %p1050_p9 = pneg %p1049_p7 }
  0x45   : > { %p1057_p1 = pnand %p1056_p2, %p1050_p9 }
  0x47   : > { %1060 = shalt.err (!%p1057_p1)
}
  0x48   : > { %924 = dma.hbm_to_vmem [thread:$0]  (!%p1362_p11), %s1652_s3, 256, %s1366_s24, [#allocation6], %s1241_s16, %s1241_s16, %s1242_s25  }
  0x49   : > { %s42_s18 = sadd.s32 1, %s1233_s13  ;;  %s51_s26 = sadd.s32 1, %s1225_s11 }
  0x4a   : > { %p44_p13 = scmp.ge.s32.totalorder %s42_s18, 2  ;;  %p58_p6 = scmp.ne.s32.totalorder %s1225_s11, %s1221_s10 }
  0x4b   : > { %p59_p10 = scmp.eq.s32.totalorder %s1237_s14, 0  ;;  %p941_p3 = scmp.lt.s32.totalorder %s1237_s14, 2 }
  0x4c   : > { %s1700_s18 = smov (%p44_p13, %s42_s18), 0  ;;  %p1677_p7 = scmp.eq.s32.totalorder %s1330_s15, 1 }
  0x4d   : > { %p60_p5 = por %p59_p10, %p58_p6  ;;  %s46_s27 = ssub.s32 %s1233_s13, %s1700_s18 }
  0x4e   : > { %p1430_p9 = por %p1677_p7, %p58_p6  ;;  %s336_s28 = sand.u32 1, %s1225_s11  }
  0x4f   : > { %p49_p12 = scmp.eq.s32.totalorder %s46_s27, 0  ;;  %s840_s24 = sshll.u32 %s336_s28, 3 }
  0x50   : > { %s1678_s22 = scalar_select %p1430_p9, 1, 0 }
  0x51   : > { %s841_s16 = sshll.u32 %s1233_s13, 7  ;;  %s1679_s0 = sld [smem:[#allocation18_spill]] }
  0x52   : > { %s1439_s25 = scalar_select %p49_p12, %s1225_s11, %s51_s26  }
  0x53   : > { %s340_s21 = scalar_lea.vmem [#allocation2], %s840_s24  ;;  %p1448_p11 = pnand %p941_p3, %p60_p5 }
  0x54   : > { %s348_s9 = sshll.u32 %s340_s21, 4  ;;  %s337_s26 = scalar_lea.sflag [#allocation3], %s336_s28  ;;  %s1452_s9 = int_to_ptr.vmem [resolvable:$true] %s348_s9 }
  0x55   : > { %p1063_p2 = pneg %p1448_p11 }
  0x57   : > { %s1444_s23 = scalar_lea.hbm %s1679_s0, %s841_s16  ;;  %s1066_s29 = scalar_lea.hbm %s1679_s0, 256 }
  0x58   : > { %s1061_s27 = scalar_lea.hbm %s1444_s23, 128  ;;  %p1067_p6 = scmp.lt.u32.totalorder %s1444_s23, %s1679_s0 }
  0x59   : > { %p1062_p0 = scmp.ne.s32.totalorder %s1444_s23, %s1061_s27  ;;  %p1068_p10 = scmp.lt.u32.totalorder %s1066_s29, %s1061_s27 }
  0x5a   : > { %p1070_p5 = scmp.lt.u32.totalorder %s1061_s27, %s1444_s23 }
  0x5b   : > { %p1064_p1 = pnand %p1063_p2, %p1062_p0  ;;  %p1069_p3 = por %p1068_p10, %p1067_p6 }
  0x5d   : > { %p1065_p13 = pneg %p1064_p1  ;;  %p1071_p7 = por %p1070_p5, %p1069_p3 }
  0x5f   : > { %p1072_p12 = pnand %p1071_p7, %p1065_p13 }
  0x61   : > { %1075 = shalt.err (!%p1072_p12)
}
  0x62   : > { %s1076_s28 = scalar_lea.vmem %s1452_s9, 128  ;;  %s1243_s24 = smov [#allocation2]  }
  0x63   : > { %p1077_p0 = scmp.ne.s32.totalorder %s1452_s9, %s1076_s28  ;;  %s1081_s16 = sshll.u32 %s1243_s24, 4  ;;  %s1082_s16 = int_to_ptr.vmem [resolvable:$false] %s1081_s16 }
  0x64   : > { %s1083_s20 = scalar_lea.vmem %s1082_s16, 256  ;;  %p1084_p4 = scmp.lt.s32.totalorder %s1452_s9, %s1082_s16 }
  0x65   : > { %p1079_p1 = pnand %p1077_p0, %p1063_p2  ;;  %p1085_p6 = scmp.lt.s32.totalorder %s1083_s20, %s1076_s28 }
  0x67   : > { %p1080_p9 = pneg %p1079_p1  ;;  %p1086_p10 = por %p1085_p6, %p1084_p4 }
  0x69   : > { %p1087_p3 = pnand %p1086_p10, %p1080_p9 }
  0x6b   : > { %1090 = shalt.err (!%p1087_p3)
}
  0x6c   : > { %928 = dma.hbm_to_vmem [thread:$0]  (!%p1448_p11), %s1444_s23, 128, %s1452_s9, %s337_s26  }
  0x6d   : > { %357 = sbr.rel (%p1351_p8) target bundleno = 409 (0x199), region = 48  ;;  %s1482_s27 = sand.u32 (!%p1351_p8), 1, %s1221_s10  }
  0x6e   : > { %s843_s29 = sshll.u32 (!%p1351_p8), %s1482_s27, 3  ;;  %s360_s21 = scalar_lea.sflag (!%p1351_p8), [#allocation3], %s1482_s27 }
  0x6f   : > { %s363_s28 = scalar_lea.vmem (!%p1351_p8), [#allocation2], %s843_s29  ;;  %p1681_p4 = scmp.ne.s32.totalorder (!%p1351_p8), %s1671_s17, 0 }
  0x74   : > { %1200 = dma.done.wait (%p1681_p4), %s360_s21, 128  }
  0x75   : > { %1202 = vsyncadd (%p1681_p4), %s360_s21, 4294967168  ;;  %p1682_p9 = scmp.eq.s32.totalorder %s1330_s15, 0 }
  0x77   : > { %1204 = dma.done.wait (%p1682_p9), [#allocation6], 512   ;;  %p1683_p11 = pmov %p1682_p9 }
  0x78   : > { %v1244_v0 = vmov 0.0   ;;  %vm1245_vm0 = vmmov 0   ;;  %v999_v1 = vld [vmem:[#allocation5] sm:$0xff]   ;;  %v1000_v2 = vld [vmem:[#allocation5 + $0x8] sm:$0xff]   ;;  %v1001_v3 = vld [vmem:[#allocation7] sm:$0xff]   ;;  %vm442_vm1 = vcmask 261120  }
  0x79   : > { %1206 = vsyncadd (%p1683_p11), [#allocation6], 4294966784  ;;  %878 = vmatprep.subr.bf16.mxu0 %v1244_v0  ;;  %886 = vmatprep.subr.bf16.mxu1 %v1244_v0  ;;  %v417_v4 = vld [vmem:[%s363_s28] sm:$0xff]  ;;  %s1504_s30 = sshll.u32 %s1482_s27, 2  ;;  %s1513_s29 = sshll.u32 %s1229_s12, 6  ;;  %vm613_vm2 = vcmask 257024  }
  0x7a   : > { %882 = vmatprep.mubr.msk.bf16.mxu0 %vm1245_vm0, %v1244_v0  ;;  %890 = vmatprep.mubr.msk.bf16.mxu1 %vm1245_vm0, %v1244_v0  ;;  %v418_v5 = vpack.c.bf16 %v417_v4, %v417_v4  ;;  %v1003_v6 = vld [vmem:[#allocation7 + $0x8] sm:$0xff]   ;;  %v1002_v7 = vld [vmem:[%s1654_s5] sm:$0xff]   ;;  %s401_s21 = scalar_lea.vmem [#allocation8], %s1504_s30  ;;  %s1666_s19 = scalar_lea.vmem [#allocation9], %s1504_s30 }
  0x7b   : > { %879 = vmatpush3.bf16.msra.mxu0 %v999_v1  ;;  %887 = vmatpush3.bf16.msra.mxu1 %v1001_v3  ;;  %v1004_v8 = vld [vmem:[%s1654_s5 + $0x8] sm:$0xff]   ;;  %v849_v9 = vld [vmem:[%s1651_s2] ss:$0 sm:$0xff]  ;;  %s644_s28 = sshll.u32 %s401_s21, 4  ;;  %s658_s23 = sshll.u32 %s1666_s19, 4  ;;  %s1526_s28 = int_to_ptr.vmem [resolvable:$true] %s644_s28  ;;  %s1534_s23 = int_to_ptr.vmem [resolvable:$true] %s658_s23 }
  0x7c   : > { %880 = vmatprep.subr.bf16.mxu0 %v1244_v0  ;;  %888 = vmatprep.subr.bf16.mxu1 %v1244_v0  ;;  %v853_v11 = vld [vmem:[%s1653_s4] ss:$0 sm:$0xff]  ;;  %s1524_s26 = scalar_lea.hbm %s1656_s7, %s1513_s29  ;;  %s1532_s20 = scalar_lea.hbm %s1657_s8, %s1513_s29 }
  0x7d   : > { %v857_v23 = vld [vmem:[%s1655_s6] ss:$0 sm:$0xff]  ;;  %s620_s17 = scalar_lea.sflag [#allocation4], %s1482_s27  ;;  %s1091_s19 = scalar_lea.vmem %s1526_s28, 64 }
  0x7e   : > { %p1092_p8 = scmp.ne.s32.totalorder %s1526_s28, %s1091_s19  ;;  %p1684_p2 = scmp.ne.s32.totalorder %s1678_s22, 0 }
  0x7f   : > { %881 = vmatpush3.bf16.msra.mxu0 %v1000_v2  ;;  %889 = vmatpush3.bf16.msra.mxu1 %v1003_v6  ;;  %s1246_s0 = smov [#allocation8]  }
  0x80   : > { %894 = vmatprep.subr.bf16.mxu0 %v1244_v0  ;;  %p1093_p13 = pnand %p1092_p8, %p1684_p2  ;;  %s1095_s1 = sshll.u32 %s1246_s0, 4  ;;  %s1096_s1 = int_to_ptr.vmem [resolvable:$false] %s1095_s1 }
  0x81   : > { %s1097_s24 = scalar_lea.vmem %s1096_s1, 128  ;;  %p1098_p7 = scmp.lt.s32.totalorder %s1526_s28, %s1096_s1 }
  0x82   : > { %883 = vmatmul.mubr.msk.bf16.vlgmr.msra.gmra.mrb[0].mxu0 %vm442_vm1, %v418_v5  ;;  %891 = vmatmul.mubr.msk.bf16.vlgmr.msra.gmra.mrb[0].mxu1 %vm442_vm1, %v418_v5  ;;  %p1094_p5 = pneg %p1093_p13  ;;  %p1099_p12 = scmp.lt.s32.totalorder %s1097_s24, %s1091_s19 }
  0x83   : > { %895 = vmatpush3.bf16.msra.mxu0 %v1002_v7  ;;  %898 = vmatprep.mubr.msk.bf16.mxu0 %vm1245_vm0, %v1244_v0 }
  0x84   : > { %896 = vmatprep.subr.bf16.mxu0 %v1244_v0  ;;  %p1100_p0 = por %p1099_p12, %p1098_p7 }
  0x86   : > { %p1101_p1 = pnand %p1100_p0, %p1094_p5 }
  0x87   : > { %897 = vmatpush3.bf16.msra.mxu0 %v1004_v8 }
  0x8a   : > { %899 = vmatmul.mubr.msk.bf16.vlgmr.msra.gmra.mrb[4].mxu0 %vm442_vm1, %v418_v5 }
 0x155   : > { %v480_v10 = vpop.f32.mrb[0].mxu0  ;;  %v543_v15 = vpop.f32.mrb[0].mxu1 }
 0x156   : > { %v481_v12 = vadd.f32 %v849_v9, %v480_v10  ;;  %v884_v13 = vpop.f32.mrb[1].mxu0  ;;  %v544_v18 = vadd.f32 %v853_v11, %v543_v15  ;;  %v892_v19 = vpop.f32.mrb[1].mxu1 }
 0x157   : > { %v483_v14 = vpop.f32.mrb[2].mxu0  ;;  %v546_v20 = vpop.f32.mrb[2].mxu1 }
 0x158   : > { %v612_v16 = vpack.c.bf16 %v481_v12, %v481_v12  ;;  %v885_v17 = vpop.f32.mrb[3].mxu0  ;;  %v615_v21 = vpack.c.bf16 %v544_v18, %v544_v18  ;;  %v893_v22 = vpop.f32.mrb[3].mxu1 }
 0x15a   : > { %614 = vst.msk [vmem:[%s401_s21] sm:$0xf] %vm613_vm2, %v612_v16 }
 0x15b   : > { %1104 = shalt.err (!%p1101_p1)
}
 0x15c   : > { %s1105_s27 = scalar_lea.hbm %s1524_s26, 64  ;;  %s1109_s0 = scalar_lea.hbm %s1656_s7, 128 }
 0x15d   : > { %p1106_p6 = scmp.ne.s32.totalorder %s1524_s26, %s1105_s27  ;;  %p1110_p4 = scmp.lt.u32.totalorder %s1524_s26, %s1656_s7 }
 0x15e   : > { %p1111_p9 = scmp.lt.u32.totalorder %s1109_s0, %s1105_s27  ;;  %p1113_p8 = scmp.lt.u32.totalorder %s1105_s27, %s1524_s26 }
 0x15f   : > { %p1107_p10 = pnand %p1106_p6, %p1684_p2 }
 0x160   : > { %p1112_p11 = por %p1111_p9, %p1110_p4 }
 0x161   : > { %p1108_p3 = pneg %p1107_p10 }
 0x162   : > { %p1114_p13 = por %p1113_p8, %p1112_p11 }
 0x164   : > { %p1115_p5 = pnand %p1114_p13, %p1108_p3 }
 0x166   : > { %1118 = shalt.err (!%p1115_p5)
}
 0x167   : > { %912 = dma.vmem_to_hbm [thread:$0]  (%p1684_p2), %s1526_s28, 64, %s1524_s26, %s620_s17   ;;  %v606_v24 = vpop.f32.mrb[4].mxu0 }
 0x168   : > { %s1685_s19 = scalar_lea.vmem [#allocation9], %s1504_s30  ;;  %s415_s9 = scalar_lea.vmem [#allocation11], %s1504_s30 }
 0x169   : > { %616 = vst.msk [vmem:[%s1685_s19] sm:$0xf] %vm613_vm2, %v615_v21  ;;  %s1568_s24 = sshll.u32 %s415_s9, 4  ;;  %s1686_s27 = sand.u32 1, %s1330_s15   ;;  %s673_s24 = int_to_ptr.vmem [resolvable:$true] %s1568_s24 }
 0x16a   : > { %s1572_s21 = scalar_lea.sflag [#allocation10], %s1686_s27  ;;  %s1119_s16 = scalar_lea.vmem %s1534_s23, 64 }
 0x16b   : > { %p1120_p7 = scmp.ne.s32.totalorder %s1534_s23, %s1119_s16  ;;  %s1247_s0 = smov [#allocation9]  }
 0x16c   : > { %s1123_s12 = sshll.u32 %s1247_s0, 4  ;;  %s1124_s12 = int_to_ptr.vmem [resolvable:$false] %s1123_s12 }
 0x16d   : > { %p1121_p12 = pnand %p1120_p7, %p1684_p2  ;;  %s1125_s28 = scalar_lea.vmem %s1124_s12, 128 }
 0x16e   : > { %p1126_p1 = scmp.lt.s32.totalorder %s1534_s23, %s1124_s12  ;;  %p1127_p6 = scmp.lt.s32.totalorder %s1125_s28, %s1119_s16 }
 0x16f   : > { %p1122_p0 = pneg %p1121_p12 }
 0x170   : > { %p1128_p10 = por %p1127_p6, %p1126_p1 }
 0x172   : > { %p1129_p3 = pnand %p1128_p10, %p1122_p0 }
 0x174   : > { %1132 = shalt.err (!%p1129_p3)
}
 0x175   : > { %s1133_s15 = scalar_lea.hbm %s1532_s20, 64  ;;  %s1137_s1 = scalar_lea.hbm %s1657_s8, 128 }
 0x176   : > { %p1134_p4 = scmp.ne.s32.totalorder %s1532_s20, %s1133_s15  ;;  %p1138_p8 = scmp.lt.u32.totalorder %s1532_s20, %s1657_s8 }
 0x177   : > { %p1139_p13 = scmp.lt.u32.totalorder %s1137_s1, %s1133_s15  ;;  %p1141_p7 = scmp.lt.u32.totalorder %s1133_s15, %s1532_s20 }
 0x178   : > { %p1135_p9 = pnand %p1134_p4, %p1684_p2 }
 0x179   : > { %p1140_p5 = por %p1139_p13, %p1138_p8 }
 0x17a   : > { %p1136_p11 = pneg %p1135_p9 }
 0x17b   : > { %p1142_p12 = por %p1141_p7, %p1140_p5 }
 0x17d   : > { %p1143_p0 = pnand %p1142_p12, %p1136_p11 }
 0x17f   : > { %1146 = shalt.err (!%p1143_p0)
}
 0x180   : > { %913 = dma.vmem_to_hbm [thread:$0]  (%p1684_p2), %s1534_s23, 64, %s1532_s20, %s1572_s21   ;;  %v607_v25 = vadd.f32 %v857_v23, %v606_v24  ;;  %v900_v26 = vpop.f32.mrb[5].mxu0 }
 0x181   : > { %v609_v27 = vpop.f32.mrb[6].mxu0  ;;  %s1687_s12 = sld [smem:[#allocation20_spill]]  ;;  %s1147_s17 = scalar_lea.vmem %s673_s24, 64 }
 0x182   : > { %v617_v28 = vpack.c.bf16 %v607_v25, %v607_v25  ;;  %v901_v29 = vpop.f32.mrb[7].mxu0  ;;  %p1148_p1 = scmp.ne.s32.totalorder %s673_s24, %s1147_s17  ;;  %s1248_s23 = smov [#allocation11]  }
 0x183   : > { %s1151_s20 = sshll.u32 %s1248_s23, 4  ;;  %s1152_s20 = int_to_ptr.vmem [resolvable:$false] %s1151_s20 }
 0x184   : > { %618 = vst.msk [vmem:[%s415_s9] sm:$0xf] %vm613_vm2, %v617_v28  ;;  %p1149_p6 = pnand %p1148_p1, %p1684_p2  ;;  %s1153_s26 = scalar_lea.vmem %s1152_s20, 128 }
 0x185   : > { %p1154_p3 = scmp.lt.s32.totalorder %s673_s24, %s1152_s20  ;;  %p1155_p4 = scmp.lt.s32.totalorder %s1153_s26, %s1147_s17 }
 0x186   : > { %p1150_p10 = pneg %p1149_p6 }
 0x187   : > { %s1688_s28 = smov %s1687_s12  ;;  %s1600_s15 = scalar_lea.hbm %s1687_s12, %s1513_s29 }
 0x188   : > { %p1156_p9 = por %p1155_p4, %p1154_p3 }
 0x18a   : > { %p1157_p11 = pnand %p1156_p9, %p1150_p10 }
 0x18c   : > { %1160 = shalt.err (!%p1157_p11)
}
 0x18d   : > { %s1161_s30 = scalar_lea.hbm %s1600_s15, 64  ;;  %s1165_s1 = scalar_lea.hbm %s1688_s28, 128 }
 0x18e   : > { %p1162_p8 = scmp.ne.s32.totalorder %s1600_s15, %s1161_s30  ;;  %p1166_p7 = scmp.lt.u32.totalorder %s1600_s15, %s1688_s28 }
 0x18f   : > { %p1167_p12 = scmp.lt.u32.totalorder %s1165_s1, %s1161_s30  ;;  %p1169_p1 = scmp.lt.u32.totalorder %s1161_s30, %s1600_s15 }
 0x190   : > { %p1163_p13 = pnand %p1162_p8, %p1684_p2 }
 0x191   : > { %p1168_p0 = por %p1167_p12, %p1166_p7 }
 0x192   : > { %p1164_p5 = pneg %p1163_p13 }
 0x193   : > { %p1170_p6 = por %p1169_p1, %p1168_p0 }
 0x195   : > { %p1171_p10 = pnand %p1170_p6, %p1164_p5 }
 0x197   : > { %1174 = shalt.err (!%p1171_p10)
}
 0x198   : > { %914 = dma.vmem_to_hbm [thread:$0]  (%p1684_p2), %s673_s24, 64, %s1600_s15, %s1572_s21  }
 0x199 PF: > { %s1689_s16 = sld [smem:[#allocation16_spill]]  ;;  %s1690_s0 = sld [smem:[#allocation17_spill]] }
 0x19a   : > { %p1692_p4 = scmp.ge.s32.totalorder %s1237_s14, 2 }
 0x19f   : > { %s684_s12 = sand.u32 1, %s1689_s16   ;;  %p1691_p3 = scmp.ne.s32.totalorder %s1690_s0, 0 }
 0x1a0   : > { %s685_s17 = scalar_lea.sflag [#allocation4], %s684_s12 }
 0x1a1   : > { %p930_p9 = pnand %p1692_p4, %p1691_p3 }
 0x1a3   : > { %1208 = dma.done.wait (!%p930_p9), %s685_s17, 64  }
 0x1a4   : > { %1210 = vsyncadd (!%p930_p9), %s685_s17, 4294967232  ;;  %s1693_s23 = sadd.s32 4294967294, %s1237_s14  }
 0x1a5   : > { %s693_s20 = sand.u32 1, %s1693_s23  }
 0x1a6   : > { %s694_s26 = scalar_lea.sflag [#allocation10], %s693_s20 }
 0x1a7   : > { %1212 = dma.done.wait (!%p930_p9), %s694_s26, 128  }
 0x1a8   : > { %1214 = vsyncadd (!%p930_p9), %s694_s26, 4294967168  ;;  %s30_s14 = sadd.s32 1, %s1237_s14   ;;  %s1694_s30 = smov %s1221_s10 }
 0x1a9   : > { %p27_p2 = scmp.ge.s32.totalorder %s30_s14, 4   ;;  %s1695_s10 = smov %s1225_s11 }
 0x1aa   : > { %s1696_s11 = smov %s1439_s25  ;;  %s1697_s12 = smov %s1233_s13 }
 0x1ab   : > { %s1698_s13 = smov %s1700_s18  ;;  %29 = sbr.rel (!%p27_p2) target bundleno = 13 (0xd), region = 133 }
 0x1b2   :  { %708 = vsyncpa [#allocation3], 1 }
 0x1b3   :  { %710 = vsyncpa [#allocation3 + $0x1], 1 }
 0x1b4   :  { %711 = vsyncpa [#allocation6], 1 }
 0x1b5   :  { %712 = vsyncpa [#allocation4], 1 }
 0x1b6   :  { %714 = vsyncpa [#allocation4 + $0x1], 1 }
 0x1b7   :  { %715 = vsyncpa [#allocation10], 1 }
 0x1b8   :  { %717 = vsyncpa [#allocation10 + $0x1], 1 }

</bundles_post_ra>
